<compile_context>
chip_gen: v7x
topology: tpu7x:2x2x1
jax: 0.10.0
libtpu: 0.0.40
codegen_flags: <defaults>
</compile_context>

<pallas_src>
import jax
import jax.numpy as jnp
from jax import lax
from jax.experimental import pallas as pl
from jax.experimental.pallas import tpu as pltpu

_NEG_BIG = 1e30  # f32-safe mask constant; never cast masked scores below f32.


def _span_graph_kernel(reprs_ref, mask_ref, out_ref):
    """Refresh `Bb` independent span graphs in one grid step.

    reprs_ref: (Bb, N, D)  in the input dtype (f32 or bf16)
    mask_ref : (Bb, 1, N)  f32, 1.0 = valid node, 0.0 = padding
    out_ref  : (Bb, N, D)
    """
    bb, _, d = reprs_ref.shape
    scale = 1.0 / float(d) ** 0.5

    for i in range(bb):                       # static unroll, bb <= 8
        x = reprs_ref[i]                      # (N, D), input dtype -> bf16 MXU path
        mask = mask_ref[i]                    # (1, N), f32
        # Additive key bias: 0 for valid keys, -1e30 for padded keys (f32 only).
        bias = (mask - 1.0) * _NEG_BIG        # (1, N)

        # Node-to-node affinities on the MXU (A @ A^T via transposed contraction,
        # no explicit transpose), f32 accumulation.
        scores = lax.dot_general(
            x, x, (((1,), (1,)), ((), ())),
            preferred_element_type=jnp.float32) * scale + bias        # (N, N) f32

        # Numerically-stable softmax over key nodes, all f32 (v5e has no bf16 VPU/EUP).
        m = jnp.max(scores, axis=-1, keepdims=True)
        p = jnp.exp(scores - m)
        denom = jnp.sum(p, axis=-1, keepdims=True)      # >= 1 after max-sub: no eps
        attn = (p * pl.reciprocal(denom, approx=True)).astype(x.dtype)

        # Message aggregation on the MXU; zero padded query rows with one multiply.
        new_x = jnp.dot(attn, x, preferred_element_type=jnp.float32)  # (N, D) f32
        out_ref[i] = (new_x * mask.T).astype(out_ref.dtype)


def _batch_block(B: int, N: int, D: int, itemsize: int) -> int:
    """How many graphs to fold into one grid step.

    Big enough that the ~0.35us per-step overhead is amortized for small N/D,
    small enough to stay far inside the scoped-VMEM budget (v7x: 64 MiB
    physical / 32 MiB scoped default) and to keep the static unroll bounded.
    """
    # Rough per-graph working set: in+out tiles, mask, f32 scores/probs, f32 acc.
    per_b = 2 * N * D * itemsize + N * 4 + 2 * N * N * 4 + N * D * 4
    budget = 8 << 20                                   # headroom for double buffering
    cap = max(1, min(B, 8, budget // max(per_b, 1)))
    # For sizable graphs keep >=2 grid steps so both v7x TensorCores get work.
    if B >= 2 and per_b >= (1 << 19):
        cap = min(cap, max(1, B // 2))
    for c in range(cap, 0, -1):                        # largest divisor of B <= cap
        if B % c == 0:
            return c
    return 1


def span_graph_encoder(span_reprs: jax.Array, span_mask: jax.Array) -> jax.Array:
    """span_reprs: [B, N, D], span_mask: [B, N] -> [B, N, D]"""
    B, N, D = span_reprs.shape
    itemsize = jnp.dtype(span_reprs.dtype).itemsize
    # Mask stays f32 regardless of the repr dtype so the -1e30 bias never
    # overflows a low-precision type.
    mask3 = span_mask.astype(jnp.float32).reshape(B, 1, N)

    bb = _batch_block(B, N, D, itemsize)
    grid = (B // bb,)

    # Explicit scoped-VMEM limit with headroom over the double-buffered blocks,
    # capped at 32 MiB so it is valid on v7x's 64 MiB physical VMEM as well.
    io_bytes = bb * (2 * N * D * itemsize + N * 4)
    vmem_limit = int(min(max(4 * io_bytes + (4 << 20), 16 << 20), 32 << 20))

    return pl.pallas_call(
        _span_graph_kernel,
        out_shape=jax.ShapeDtypeStruct((B, N, D), span_reprs.dtype),
        grid_spec=pltpu.PrefetchScalarGridSpec(
            num_scalar_prefetch=0,
            grid=grid,
            in_specs=[
                pl.BlockSpec((bb, N, D), lambda b: (b, 0, 0)),
                pl.BlockSpec((bb, 1, N), lambda b: (b, 0, 0)),
            ],
            out_specs=pl.BlockSpec((bb, N, D), lambda b: (b, 0, 0)),
        ),
        compiler_params=pltpu.CompilerParams(
            dimension_semantics=("parallel",),
            vmem_limit_bytes=vmem_limit,
        ),
    )(span_reprs, mask3)


def _reference(span_reprs, span_mask):
    x = span_reprs.astype(jnp.float32)
    key_mask = span_mask.astype(jnp.float32)[:, None, :]        # (B, 1, N)
    scale = 1.0 / jnp.sqrt(jnp.float32(x.shape[-1]))
    scores = jnp.einsum("bqd,bkd->bqk", x, x) * scale
    scores = jnp.where(key_mask > 0.5, scores, -_NEG_BIG)
    m = jnp.max(scores, axis=-1, keepdims=True)
    p = jnp.exp(scores - m)
    attn = p / jnp.sum(p, axis=-1, keepdims=True)
    new_x = jnp.einsum("bqk,bkd->bqd", attn, x)
    q_mask = span_mask.astype(jnp.float32)[:, :, None]
    return jnp.where(q_mask > 0.5, new_x, 0.0).astype(span_reprs.dtype)


if __name__ == "__main__":
    key = jax.random.PRNGKey(0)
    B, N, D = 2, 8, 32  # batch, num_spans, embedded_span_size

    span_reprs = jax.random.normal(key, (B, N, D), dtype=jnp.float32)
    # batch 0: all spans valid; batch 1: last 3 spans are padding
    span_mask = jnp.array(
        [[1, 1, 1, 1, 1, 1, 1, 1],
         [1, 1, 1, 1, 1, 0, 0, 0]], dtype=jnp.float32)

    out = jax.block_until_ready(span_graph_encoder(span_reprs, span_mask))
    ref = _reference(span_reprs, span_mask)
    assert out.shape == (B, N, D)
    assert bool(jnp.allclose(out, ref, atol=1e-2, rtol=1e-2)), "mismatch vs reference"

    # bf16 smoke test: exercises the low-precision MXU operand path (f32 accumulation).
    out_bf16 = jax.block_until_ready(
        span_graph_encoder(span_reprs.astype(jnp.bfloat16), span_mask))
    assert out_bf16.shape == (B, N, D)
    assert bool(jnp.all(jnp.isfinite(out_bf16.astype(jnp.float32))))

    print("KERNEL_OK")
</pallas_src>

<mosaic_0001>
module attributes {stable_mosaic.version = 11 : i64} {
  func.func @_span_graph_kernel(%arg0: i32, %arg1: memref<2x8x32xf32, #tpu.memory_space<vmem>>, %arg2: memref<2x1x8xf32, #tpu.memory_space<vmem>>, %arg3: memref<2x8x32xf32, #tpu.memory_space<vmem>>) attributes {dimension_semantics = [#tpu.dimension_semantics<parallel>], iteration_bounds = array<i64: 1>, scalar_prefetch = 0 : i64, scratch_operands = 0 : i64, tpu.core_type = #tpu.core_type<tc>, window_params = [{transform_indices = @transform_0, window_bounds = array<i64: 2, 8, 32>}, {transform_indices = @transform_1, window_bounds = array<i64: 2, 1, 8>}, {transform_indices = @transform_2, window_bounds = array<i64: 2, 8, 32>}]} {
    %c0 = arith.constant 0 : index
    %c0_0 = arith.constant 0 : index
    %c0_1 = arith.constant 0 : index
    %0 = vector.load %arg1[%c0, %c0_0, %c0_1] : memref<2x8x32xf32, #tpu.memory_space<vmem>>, vector<1x8x32xf32>
    %1 = vector.shape_cast %0 : vector<1x8x32xf32> to vector<8x32xf32>
    %c0_2 = arith.constant 0 : index
    %c0_3 = arith.constant 0 : index
    %c0_4 = arith.constant 0 : index
    %2 = vector.load %arg2[%c0_2, %c0_3, %c0_4] : memref<2x1x8xf32, #tpu.memory_space<vmem>>, vector<1x1x8xf32>
    %3 = vector.shape_cast %2 : vector<1x1x8xf32> to vector<1x8xf32>
    %cst = arith.constant 1.000000e+00 : f32
    %4 = vector.broadcast %cst : f32 to vector<1x8xf32>
    %5 = arith.subf %3, %4 : vector<1x8xf32>
    %cst_5 = arith.constant 1.000000e+30 : f32
    %6 = vector.broadcast %cst_5 : f32 to vector<1x8xf32>
    %7 = arith.mulf %5, %6 : vector<1x8xf32>
    %cst_6 = arith.constant dense<0.000000e+00> : vector<8x8xf32>
    %8 = tpu.matmul %1, %1, %cst_6 {dimension_numbers = #tpu.dot_dimension_numbers<[1], [1], [0], [0], [0, 0, 1, 0], [], []>} : vector<8x32xf32>, vector<8x32xf32>, vector<8x8xf32> -> vector<8x8xf32>
    %cst_7 = arith.constant 0.176776692 : f32
    %9 = vector.broadcast %cst_7 : f32 to vector<8x8xf32>
    %10 = arith.mulf %8, %9 : vector<8x8xf32>
    %11 = vector.broadcast %7 : vector<1x8xf32> to vector<8x8xf32>
    %12 = arith.addf %10, %11 : vector<8x8xf32>
    %cst_8 = arith.constant dense<0xFF800000> : vector<8xf32>
    %13 = vector.multi_reduction <maximumf>, %12, %cst_8 [1] : vector<8x8xf32> to vector<8xf32>
    %14 = vector.shape_cast %13 : vector<8xf32> to vector<8x1xf32>
    %15 = vector.broadcast %14 : vector<8x1xf32> to vector<8x8xf32>
    %16 = arith.subf %12, %15 : vector<8x8xf32>
    %17 = math.exp %16 : vector<8x8xf32>
    %cst_9 = arith.constant dense<0.000000e+00> : vector<8xf32>
    %18 = vector.multi_reduction <add>, %17, %cst_9 [1] : vector<8x8xf32> to vector<8xf32>
    %19 = vector.shape_cast %18 : vector<8xf32> to vector<8x1xf32>
    %20 = tpu.reciprocal %19 {approx = true} : vector<8x1xf32> -> vector<8x1xf32>
    %21 = vector.broadcast %20 : vector<8x1xf32> to vector<8x8xf32>
    %22 = arith.mulf %17, %21 : vector<8x8xf32>
    %cst_10 = arith.constant dense<0.000000e+00> : vector<8x32xf32>
    %23 = tpu.matmul %22, %1, %cst_10 {dimension_numbers = #tpu.dot_dimension_numbers<[1], [0], [0], [1], [0, 0, 1, 1], [], []>} : vector<8x8xf32>, vector<8x32xf32>, vector<8x32xf32> -> vector<8x32xf32>
    %24 = tpu.transpose %3, [1, 0] : vector<1x8xf32> -> vector<8x1xf32>
    %25 = vector.broadcast %24 : vector<8x1xf32> to vector<8x32xf32>
    %26 = arith.mulf %23, %25 : vector<8x32xf32>
    %c0_11 = arith.constant 0 : index
    %c0_12 = arith.constant 0 : index
    %c0_13 = arith.constant 0 : index
    %27 = vector.load %arg3[%c0_11, %c0_12, %c0_13] : memref<2x8x32xf32, #tpu.memory_space<vmem>>, vector<1x8x32xf32>
    %28 = vector.shape_cast %27 : vector<1x8x32xf32> to vector<8x32xf32>
    %29 = vector.shape_cast %26 : vector<8x32xf32> to vector<1x8x32xf32>
    tpu.vector_store %arg3[%c0_11, %c0_12, %c0_13], %29 {strides = array<i32>} : memref<2x8x32xf32, #tpu.memory_space<vmem>>, vector<1x8x32xf32>,
    %c1 = arith.constant 1 : index
    %c0_14 = arith.constant 0 : index
    %c0_15 = arith.constant 0 : index
    %30 = vector.load %arg1[%c1, %c0_14, %c0_15] : memref<2x8x32xf32, #tpu.memory_space<vmem>>, vector<1x8x32xf32>
    %31 = vector.shape_cast %30 : vector<1x8x32xf32> to vector<8x32xf32>
    %c1_16 = arith.constant 1 : index
    %c0_17 = arith.constant 0 : index
    %c0_18 = arith.constant 0 : index
    %32 = vector.load %arg2[%c1_16, %c0_17, %c0_18] : memref<2x1x8xf32, #tpu.memory_space<vmem>>, vector<1x1x8xf32>
    %33 = vector.shape_cast %32 : vector<1x1x8xf32> to vector<1x8xf32>
    %cst_19 = arith.constant 1.000000e+00 : f32
    %34 = vector.broadcast %cst_19 : f32 to vector<1x8xf32>
    %35 = arith.subf %33, %34 : vector<1x8xf32>
    %cst_20 = arith.constant 1.000000e+30 : f32
    %36 = vector.broadcast %cst_20 : f32 to vector<1x8xf32>
    %37 = arith.mulf %35, %36 : vector<1x8xf32>
    %cst_21 = arith.constant dense<0.000000e+00> : vector<8x8xf32>
    %38 = tpu.matmul %31, %31, %cst_21 {dimension_numbers = #tpu.dot_dimension_numbers<[1], [1], [0], [0], [0, 0, 1, 0], [], []>} : vector<8x32xf32>, vector<8x32xf32>, vector<8x8xf32> -> vector<8x8xf32>
    %cst_22 = arith.constant 0.176776692 : f32
    %39 = vector.broadcast %cst_22 : f32 to vector<8x8xf32>
    %40 = arith.mulf %38, %39 : vector<8x8xf32>
    %41 = vector.broadcast %37 : vector<1x8xf32> to vector<8x8xf32>
    %42 = arith.addf %40, %41 : vector<8x8xf32>
    %cst_23 = arith.constant dense<0xFF800000> : vector<8xf32>
    %43 = vector.multi_reduction <maximumf>, %42, %cst_23 [1] : vector<8x8xf32> to vector<8xf32>
    %44 = vector.shape_cast %43 : vector<8xf32> to vector<8x1xf32>
    %45 = vector.broadcast %44 : vector<8x1xf32> to vector<8x8xf32>
    %46 = arith.subf %42, %45 : vector<8x8xf32>
    %47 = math.exp %46 : vector<8x8xf32>
    %cst_24 = arith.constant dense<0.000000e+00> : vector<8xf32>
    %48 = vector.multi_reduction <add>, %47, %cst_24 [1] : vector<8x8xf32> to vector<8xf32>
    %49 = vector.shape_cast %48 : vector<8xf32> to vector<8x1xf32>
    %50 = tpu.reciprocal %49 {approx = true} : vector<8x1xf32> -> vector<8x1xf32>
    %51 = vector.broadcast %50 : vector<8x1xf32> to vector<8x8xf32>
    %52 = arith.mulf %47, %51 : vector<8x8xf32>
    %cst_25 = arith.constant dense<0.000000e+00> : vector<8x32xf32>
    %53 = tpu.matmul %52, %31, %cst_25 {dimension_numbers = #tpu.dot_dimension_numbers<[1], [0], [0], [1], [0, 0, 1, 1], [], []>} : vector<8x8xf32>, vector<8x32xf32>, vector<8x32xf32> -> vector<8x32xf32>
    %54 = tpu.transpose %33, [1, 0] : vector<1x8xf32> -> vector<8x1xf32>
    %55 = vector.broadcast %54 : vector<8x1xf32> to vector<8x32xf32>
    %56 = arith.mulf %53, %55 : vector<8x32xf32>
    %c1_26 = arith.constant 1 : index
    %c0_27 = arith.constant 0 : index
    %c0_28 = arith.constant 0 : index
    %57 = vector.load %arg3[%c1_26, %c0_27, %c0_28] : memref<2x8x32xf32, #tpu.memory_space<vmem>>, vector<1x8x32xf32>
    %58 = vector.shape_cast %57 : vector<1x8x32xf32> to vector<8x32xf32>
    %59 = vector.shape_cast %56 : vector<8x32xf32> to vector<1x8x32xf32>
    tpu.vector_store %arg3[%c1_26, %c0_27, %c0_28], %59 {strides = array<i32>} : memref<2x8x32xf32, #tpu.memory_space<vmem>>, vector<1x8x32xf32>,
    return
  }
  func.func @transform_0(%arg0: i32) -> (i32, i32, i32) {
    %c0_i32 = arith.constant 0 : i32
    %c0_i32_0 = arith.constant 0 : i32
    %c0_i32_1 = arith.constant 0 : i32
    return %arg0, %c0_i32, %c0_i32_0 : i32, i32, i32
  }
  func.func @transform_1(%arg0: i32) -> (i32, i32, i32) {
    %c0_i32 = arith.constant 0 : i32
    %c0_i32_0 = arith.constant 0 : i32
    %c0_i32_1 = arith.constant 0 : i32
    return %arg0, %c0_i32, %c0_i32_0 : i32, i32, i32
  }
  func.func @transform_2(%arg0: i32) -> (i32, i32, i32) {
    %c0_i32 = arith.constant 0 : i32
    %c0_i32_0 = arith.constant 0 : i32
    %c0_i32_1 = arith.constant 0 : i32
    return %arg0, %c0_i32, %c0_i32_0 : i32, i32, i32
  }
}

</mosaic_0001>

<bundles_post_ra>
// kernel: tpu_custom_call.1
= control target key start
LH: loop header
LB: loop body
LE: loop exit
PB: predicated region body
PF: predicated region fallthrough
CT: control target
= control target key end

     0   :  { %7 = vsyncpa [#allocation3], 0  ;;  %s640_s0 = inlined_call_operand.hbm [shape: f32[2,8,32], index: 0, kind: input, shape index: {}]   ;;  %s641_s1 = inlined_call_operand.vmem [shape: f32[2,1,8], index: 1, kind: input, shape index: {}]   ;;  %s642_s2 = inlined_call_operand.hbm [shape: f32[2,8,32], index: 2, kind: output, shape index: {}]  }
   0x1   :  { %8 = vsyncpa [#allocation4], 0  ;;  %s566_s9 = smov [#allocation2]   ;;  %s518_s13 = scalar_lea.hbm %s640_s0, 256 }
   0x2   :  { %s14_s10 = sshll.u32 %s566_s9, 4  ;;  %p519_p0 = scmp.ne.s32.totalorder %s640_s0, %s518_s13  ;;  %s15_s10 = int_to_ptr.vmem [resolvable:$true] %s14_s10 }
   0x3   :  { %p522_p1 = scmp.lt.u32.totalorder %s518_s13, %s640_s0 }
   0x5   :  { %p524_p2 = pnand %p522_p1, %p519_p0 }
   0x7   :  { %527 = shalt.err (!%p524_p2)
}
   0x8   :  { %s528_s18 = scalar_lea.vmem %s15_s10, 256  ;;  %p533_p4 = scmp.lt.s32.totalorder %s15_s10, %s15_s10 }
   0x9   :  { %p529_p3 = scmp.ne.s32.totalorder %s15_s10, %s528_s18  ;;  %p534_p5 = scmp.lt.s32.totalorder %s528_s18, %s528_s18 }
   0xb   :  { %p535_p6 = por %p534_p5, %p533_p4 }
   0xd   :  { %p536_p7 = pnand %p535_p6, %p529_p3 }
   0xf   :  { %539 = shalt.err (!%p536_p7)
}
  0x10   :  { %s567_s19 = smov 128   ;;  %s568_s20 = smov 8  }
  0x11   :  { %20 = dma.hbm_to_vmem [thread:$0]  %s640_s0, 256, %s15_s10, [#allocation3], %s567_s19, %s567_s19, %s568_s20  }
  0x12   :  { %562 = dma.done.wait [#allocation3], 256  }
  0x13   :  { %563 = vsyncadd [#allocation3], 4294967040  ;;  %v569_v0 = vmov 0.0   ;;  %vm570_vm0 = vmmov 0   ;;  %vm30_vm1 = vcmask 261120   ;;  %v26_v1 = vld [vmem:[#allocation2] sm:$0xff]  ;;  %v106_v2 = vlaneseq }
  0x14   :  { %481 = vmatprep.subr.mxu0 %v569_v0  ;;  %483 = vmatprep.mubr.msk.f32.mxu0 %vm570_vm0, %v569_v0  ;;  %v27_v3 = vld [vmem:[%s641_s1] sm:$0x1]  ;;  %vm112_vm2 = vcmask 64512   ;;  %v237_v19 = vld [vmem:[#allocation2 + $0x8] sm:$0xff]  ;;  %v571_v20 = vmov 0  }
  0x15   :  { %486 = vmatprep.subr.mxu1 %v569_v0  ;;  %488 = vmatprep.mubr.msk.f32.mxu1 %vm570_vm0, %v569_v0  ;;  %v464_v4 = vadd.f32 -1.0, %v27_v3  ;;  %v107_v5 = vshrl.u32 %v106_v2, 7  ;;  %v468_v25 = vld [vmem:[%s641_s1 + $0x1] sm:$0x1]  ;;  %s572_s1 = smov [#allocation5]  }
  0x16   :  { %482 = vmatpush3.xpose.msk.msra.mxu0 %vm30_vm1, %v26_v1  ;;  %487 = vmatpush3.msra.mxu1 %v26_v1  ;;  %v469_v26 = vadd.f32 -1.0, %v468_v25  ;;  %s452_s26 = sshll.u32 %s572_s1, 4  ;;  %s453_s26 = int_to_ptr.vmem [resolvable:$true] %s452_s26 }
  0x17   :  { %491 = vmatprep.subr.mxu1 %v569_v0  ;;  %496 = vmatprep.subr.mxu0 %v569_v0  ;;  %v29_v6 = vmul.f32 1e+30, %v464_v4  ;;  %v108_v7 = vsub.s32 0, %v107_v5  ;;  %s540_s27 = scalar_lea.vmem %s453_s26, 256  ;;  %p545_p9 = scmp.lt.s32.totalorder %s453_s26, %s453_s26 }
  0x18   :  { %v241_v28 = vmul.f32 1e+30, %v469_v26  ;;  %p541_p8 = scmp.ne.s32.totalorder %s453_s26, %s540_s27  ;;  %p546_p10 = scmp.lt.s32.totalorder %s540_s27, %s540_s27 }
  0x19   :  { %484 = vmatmul.mubr.msk.f32.vlgmr.msra.gmra.mrb[0].mxu0 %vm30_vm1, %v26_v1  ;;  %v109_v8 = vrot.slane %v29_v6, %v108_v7 }
  0x1a   :  { %498 = vmatprep.mubr.msk.f32.mxu0 %vm570_vm0, %v569_v0  ;;  %497 = vmatpush3.msra.mxu0 %v237_v19  ;;  %v320_v32 = vrot.slane %v241_v28, %v108_v7  ;;  %p547_p11 = por %p546_p10, %p545_p9 }
  0x1c   :  { %p548_p12 = pnand %p547_p11, %p541_p8 }
  0xec   :  { %v100_v9 = vpop.f32.mrb[0].mxu0 }
  0xed   :  { %v104_v10 = vmul.f32 0.17677669, %v100_v9  ;;  %v485_v11 = vpop.f32.mrb[1].mxu0 }
  0xef   :  { %v111_v12 = vadd.f32 %v109_v8, %v104_v10 }
  0xf1   :  { %v113_v13 = vsel %vm112_vm2, %v111_v12, -inf }
  0xf2   :  { %114 = vmax.xlane.f32.xlu0 %v113_v13 }
 0x17f   :  { %v115_v14 = vpop.xlane.xlu0 %114 }
 0x180   :  { %v116_v15 = vsub.f32 %v111_v12, %v115_v14 }
 0x182   :  { %v117_v16 = vmul.f32 1.442695, %v116_v15 }
 0x184   :  { %510 = vpow2.f32 %v117_v16 }
 0x18e   :  { %v511_v17 = vpop.eup %510 }
 0x18f   :  { %v119_v18 = vsel %vm112_vm2, %v511_v17, 0.0 }
 0x190   :  { %120 = vadd.xlane.f32.xlu0 %v119_v18 }
 0x1bd   :  { %197 = vxpose.xlu0.b32.start.end [1/1] (short) (narrow) %v27_v3, 8 }
 0x1e6   :  { %508 = vset.pattern.permute.xlu0 %v571_v20 }
 0x21d   :  { %v121_v21 = vpop.xlane.xlu0 %120 }
 0x21e   :  { %512 = vrcp.f32 %v121_v21 }
 0x228   :  { %v513_v22 = vpop.eup %512 }
 0x229   :  { %v123_v23 = vmul.f32 %v513_v22, %v511_v17 }
 0x22b   :  { %489 = vmatmul.mubr.msk.f32.vlgmr.msra.gmra.mrb[0].mxu1 %vm112_vm2, %v123_v23 }
 0x22c   :  { %492 = vmatpush3.xpose.msk.msra.mxu1 %vm30_vm1, %v237_v19  ;;  %493 = vmatprep.mubr.msk.f32.mxu1 %vm570_vm0, %v569_v0 }
 0x22f   :  { %494 = vmatmul.mubr.msk.f32.vlgmr.msra.gmra.mrb[2].mxu1 %vm30_vm1, %v237_v19 }
 0x23d   :  { %v213_v24 = vpop.trf.xlu0 }
 0x23e   :  { %231 = vperm.xlu0 %508, %v213_v24  }
 0x2bd   :  { %v232_v27 = vpop.permute.xlu0 %231 }
 0x2fe   :  { %v193_v29 = vpop.f32.mrb[0].mxu1 }
 0x2ff   :  { %v234_v30 = vmul.f32 %v232_v27, %v193_v29  ;;  %v490_v31 = vpop.f32.mrb[1].mxu1 }
 0x301   :  { %235 = vst.msk [vmem:[#allocation5] sm:$0xff] %vm30_vm1, %v234_v30 }
 0x302   :  { %v311_v33 = vpop.f32.mrb[2].mxu1 }
 0x303   :  { %v315_v34 = vmul.f32 0.17677669, %v311_v33  ;;  %v495_v35 = vpop.f32.mrb[3].mxu1 }
 0x305   :  { %v322_v36 = vadd.f32 %v320_v32, %v315_v34 }
 0x307   :  { %v323_v37 = vsel %vm112_vm2, %v322_v36, -inf }
 0x308   :  { %324 = vmax.xlane.f32.xlu1 %v323_v37 }
 0x395   :  { %v325_v38 = vpop.xlane.xlu1 %324 }
 0x396   :  { %v326_v39 = vsub.f32 %v322_v36, %v325_v38 }
 0x398   :  { %v327_v40 = vmul.f32 1.442695, %v326_v39 }
 0x39a   :  { %514 = vpow2.f32 %v327_v40 }
 0x3a4   :  { %v515_v41 = vpop.eup %514 }
 0x3a5   :  { %v329_v42 = vsel %vm112_vm2, %v515_v41, 0.0 }
 0x3a6   :  { %330 = vadd.xlane.f32.xlu1 %v329_v42 }
 0x3d9   :  { %407 = vxpose.xlu1.b32.start.end [1/1] (short) (narrow) %v468_v25, 8 }
 0x3f7   :  { %509 = vset.pattern.permute.xlu1 %v571_v20 }
 0x433   :  { %v331_v43 = vpop.xlane.xlu1 %330 }
 0x434   :  { %516 = vrcp.f32 %v331_v43 }
 0x43e   :  { %v517_v44 = vpop.eup %516 }
 0x43f   :  { %v333_v45 = vmul.f32 %v517_v44, %v515_v41 }
 0x441   :  { %499 = vmatmul.mubr.msk.f32.vlgmr.msra.gmra.mrb[2].mxu0 %vm112_vm2, %v333_v45 }
 0x459   :  { %v423_v46 = vpop.trf.xlu1 }
 0x45a   :  { %441 = vperm.xlu1 %509, %v423_v46  }
 0x4d9   :  { %v442_v47 = vpop.permute.xlu1 %441 }
 0x514   :  { %v403_v48 = vpop.f32.mrb[2].mxu0 }
 0x515   :  { %v444_v49 = vmul.f32 %v442_v47, %v403_v48  ;;  %v500_v50 = vpop.f32.mrb[3].mxu0 }
 0x517   :  { %446 = vst.msk [vmem:[#allocation5 + $0x8] sm:$0xff] %vm30_vm1, %v444_v49 }
 0x518   :  { %551 = shalt.err (!%p548_p12)
}
 0x519   :  { %s552_s30 = scalar_lea.hbm %s642_s2, 256 }
 0x51a   :  { %p553_p13 = scmp.ne.s32.totalorder %s642_s2, %s552_s30  ;;  %p556_p0 = scmp.lt.u32.totalorder %s552_s30, %s642_s2 }
 0x51c   :  { %p558_p1 = pnand %p556_p0, %p553_p13 }
 0x51e   :  { %561 = shalt.err (!%p558_p1)
}
 0x51f   :  { %458 = dma.vmem_to_hbm [thread:$0]  %s453_s26, 256, %s642_s2, [#allocation4], %s567_s19, %s567_s19, %s568_s20  }
 0x520   :  { %564 = dma.done.wait [#allocation4], 256  }
 0x521   :  { %565 = vsyncadd [#allocation4], 4294967040 }
 0x522   :  { %462 = vsyncpa [#allocation3], 1 }
 0x523   :  { %463 = vsyncpa [#allocation4], 1 }

</bundles_post_ra>
